<compile_context>
chip_gen: v7x
topology: tpu7x:2x2x1
jax: 0.10.0
libtpu: 0.0.40
codegen_flags: <defaults>
</compile_context>

<pallas_src>
import functools
from typing import NamedTuple

import jax
import jax.numpy as jnp
from jax.experimental import pallas as pl
from jax.experimental.pallas import tpu as pltpu


def _round_up(n: int, m: int) -> int:
    return ((n + m - 1) // m) * m


# --------------------------------------------------------------------------
# Kernel: one (batch-tile i, hidden-chunk k) grid step.
# --------------------------------------------------------------------------
def _mlp_kernel(x_ref, w1_ref, b1_ref, w2_ref, b2_ref, o_ref, acc_ref):
    k = pl.program_id(1)

    @pl.when(k == 0)
    def _init():
        acc_ref[...] = jnp.zeros_like(acc_ref)

    # fc1 chunk + bias + ReLU in f32.
    h = jnp.dot(x_ref[...], w1_ref[...], preferred_element_type=jnp.float32)
    h = jnp.maximum(h + b1_ref[...], 0.0)

    # fc2 chunk, accumulated in the f32 VMEM scratch.
    acc_ref[...] += jnp.dot(h.astype(w2_ref.dtype), w2_ref[...],
                            preferred_element_type=jnp.float32)

    @pl.when(k == pl.num_programs(1) - 1)
    def _finalize():
        # Lane-dense (128-padded) store; bias added once.
        o_ref[...] = (acc_ref[...] + b2_ref[...]).astype(o_ref.dtype)


# --------------------------------------------------------------------------
# One-time parameter preparation (pad + cast hoisted out of the hot path).
# --------------------------------------------------------------------------
class PreparedParams(NamedTuple):
    w1: jax.Array          # (in_sz, hid_p)  compute dtype
    b1: jax.Array          # (1, hid_p)      f32
    w2: jax.Array          # (hid_p, out_p)  compute dtype
    b2: jax.Array          # (1, out_p)      f32
    in_sz: int
    hid: int
    out_sz: int
    hid_p: int
    out_p: int
    bh: int
    compute_dtype: jnp.dtype


def prepare_params(w1, b1, w2, b2, *, block_h: int = 512, compute_dtype=None):
    in_sz, hid = w1.shape
    out_sz = w2.shape[1]
    assert w2.shape == (hid, out_sz)
    assert b1.shape == (hid,) and b2.shape == (out_sz,)

    cdt = jnp.dtype(compute_dtype) if compute_dtype is not None else jnp.dtype(w1.dtype)

    # Hidden-dim chunking (grid reduction axis).
    if hid <= block_h:
        bh, hid_p = hid, hid
    else:
        bh = _round_up(block_h, 128)
        hid_p = _round_up(hid, bh)

    # Lane-dense output features.
    out_p = _round_up(out_sz, 128)

    # Zero padding is mathematically inert (padded w2 rows are zero; padded
    # output columns are sliced off by the caller).
    w1_p, b1_p, w2_p, b2_p = w1, b1, w2, b2
    if hid_p != hid:
        w1_p = jnp.pad(w1_p, ((0, 0), (0, hid_p - hid)))
        b1_p = jnp.pad(b1_p, (0, hid_p - hid))
        w2_p = jnp.pad(w2_p, ((0, hid_p - hid), (0, 0)))
    if out_p != out_sz:
        w2_p = jnp.pad(w2_p, ((0, 0), (0, out_p - out_sz)))
        b2_p = jnp.pad(b2_p, (0, out_p - out_sz))

    return PreparedParams(
        w1=w1_p.astype(cdt),
        b1=b1_p.reshape(1, hid_p).astype(jnp.float32),
        w2=w2_p.astype(cdt),
        b2=b2_p.reshape(1, out_p).astype(jnp.float32),
        in_sz=in_sz, hid=hid, out_sz=out_sz,
        hid_p=hid_p, out_p=out_p, bh=bh, compute_dtype=cdt)


def _vmem_cap_bytes() -> int:
    """85% of physical VMEM (~54 MiB v7x, ~108 MiB v5e/v6e)."""
    try:
        phys = int(pltpu.get_tpu_info().vmem_capacity_bytes)
    except Exception:
        phys = 64 << 20          # conservative (v7x) fallback
    return max(int(phys * 0.85), 32 << 20)


# --------------------------------------------------------------------------
# Hot-path call with pre-prepared parameters.
# --------------------------------------------------------------------------
def projection_head_prepared(x, p: PreparedParams, *, block_m: int = 256):
    B, in_sz = x.shape
    assert in_sz == p.in_sz
    cdt = p.compute_dtype
    out_dtype = x.dtype
    out_itemsize = jnp.dtype(out_dtype).itemsize
    sublane = 8 if cdt.itemsize >= 4 else 16

    # ---- batch tiling: MXU-aligned (256) when possible, else sublane -------
    base = min(block_m, B)
    align = 256 if base >= 256 else sublane
    bm = max(sublane, _round_up(base, align))
    # Auto-scale up to 1024 rows when the per-tile footprint is tiny, while
    # keeping at least 2 grid steps on the batch axis for pipelining/megacore.
    row_bytes = in_sz * cdt.itemsize + p.out_p * (4 + out_itemsize)
    while bm < 1024 and bm * 4 <= B and row_bytes * (bm * 2) < (2 << 20):
        bm *= 2
    B_p = _round_up(B, bm)

    x_p = x if B_p == B else jnp.pad(x, ((0, B_p - B), (0, 0)))
    x_p = x_p.astype(cdt)

    bh, hid_p, out_p = p.bh, p.hid_p, p.out_p
    n_h = hid_p // bh
    grid = (B_p // bm, n_h)

    # ---- explicit VMEM budget (per-step tiles, not whole weights) ----------
    est = (2 * bm * in_sz * cdt.itemsize            # x tiles (double-buffered)
           + 2 * in_sz * bh * cdt.itemsize          # w1 chunks
           + 2 * bh * 4                             # b1 chunks (f32)
           + 2 * bh * out_p * cdt.itemsize          # w2 chunks
           + 2 * out_p * 4                          # b2
           + 2 * bm * out_p * out_itemsize          # out tiles
           + bm * out_p * 4                         # f32 accumulator scratch
           + bm * bh * 4)                           # hidden intermediate
    vmem_limit = int(min(max(int(est * 1.3) + (2 << 20), 32 << 20),
                         _vmem_cap_bytes()))

    # ---- advisory cost estimate (lets XLA overlap surrounding ops) ---------
    n_i = B_p // bm
    cost = pl.CostEstimate(
        flops=2 * B_p * hid_p * (in_sz + out_p),
        transcendentals=0,
        bytes_accessed=(B_p * in_sz * cdt.itemsize
                        + B_p * out_p * out_itemsize
                        + n_i * (in_sz * hid_p * cdt.itemsize
                                 + hid_p * out_p * cdt.itemsize
                                 + (hid_p + out_p) * 4)))

    out_full = pl.pallas_call(
        _mlp_kernel,
        out_shape=jax.ShapeDtypeStruct((B_p, out_p), out_dtype),
        grid_spec=pltpu.PrefetchScalarGridSpec(
            num_scalar_prefetch=0,
            grid=grid,
            in_specs=[
                pl.BlockSpec((bm, in_sz), lambda i, k: (i, 0)),    # x tile
                pl.BlockSpec((in_sz, bh), lambda i, k: (0, k)),    # w1 chunk
                pl.BlockSpec((1, bh),     lambda i, k: (0, k)),    # b1 chunk
                pl.BlockSpec((bh, out_p), lambda i, k: (k, 0)),    # w2 chunk
                pl.BlockSpec((1, out_p),  lambda i, k: (0, 0)),    # b2
            ],
            out_specs=pl.BlockSpec((bm, out_p), lambda i, k: (i, 0)),
            scratch_shapes=[pltpu.VMEM((bm, out_p), jnp.float32)],
        ),
        compiler_params=pltpu.CompilerParams(
            dimension_semantics=("parallel", "arbitrary"),
            vmem_limit_bytes=vmem_limit,
        ),
        cost_estimate=cost,
    )(x_p, p.w1, p.b1, p.w2, p.b2)

    return out_full[:B, :p.out_sz]


# --------------------------------------------------------------------------
# Convenience one-shot wrapper (prepares params per call; for repeated
# inference calls, prepare once with prepare_params and reuse).
# --------------------------------------------------------------------------
def projection_head(x, w1, b1, w2, b2, *, block_m: int = 256,
                    block_h: int = 512, compute_dtype=None):
    prepared = prepare_params(w1, b1, w2, b2, block_h=block_h,
                              compute_dtype=compute_dtype)
    return projection_head_prepared(x, prepared, block_m=block_m)


def init_params(key, input_size, hidden_size, output_size, dtype=jnp.float32):
    """Deterministic init matching nn.Linear's U(-1/sqrt(fan_in), 1/sqrt(fan_in))."""
    k1, k2, k3, k4 = jax.random.split(key, 4)
    lim1 = 1.0 / (input_size ** 0.5)
    lim2 = 1.0 / (hidden_size ** 0.5)
    # Stored transposed relative to torch (out, in) -> (in, out).
    w1 = jax.random.uniform(k1, (input_size, hidden_size), dtype, -lim1, lim1)
    b1 = jax.random.uniform(k2, (hidden_size,), dtype, -lim1, lim1)
    w2 = jax.random.uniform(k3, (hidden_size, output_size), dtype, -lim2, lim2)
    b2 = jax.random.uniform(k4, (output_size,), dtype, -lim2, lim2)
    return w1, b1, w2, b2


if __name__ == "__main__":
    key = jax.random.PRNGKey(0)

    # Test 1: small head, single hidden chunk, batch tiled into 2 grid steps.
    in_sz, hid, out_sz, batch = 32, 64, 16, 512
    kx, kp = jax.random.split(key)
    x = jax.random.normal(kx, (batch, in_sz), jnp.float32)
    w1, b1, w2, b2 = init_params(kp, in_sz, hid, out_sz)
    ref = jnp.maximum(x @ w1 + b1, 0.0) @ w2 + b2

    out = jax.block_until_ready(projection_head(x, w1, b1, w2, b2))
    assert out.shape == (batch, out_sz)
    assert jnp.allclose(out, ref, atol=1e-5, rtol=1e-5)

    # Test 2: hidden dim split across the reduction grid axis (3 chunks),
    # ragged non-256 batch exercises sublane-aligned tiles + padding.
    in2, hid2, o2, bn2 = 48, 384, 24, 136
    kx2, kp2 = jax.random.split(kp)
    x2 = jax.random.normal(kx2, (bn2, in2), jnp.float32)
    p2 = init_params(kp2, in2, hid2, o2)
    ref2 = jnp.maximum(x2 @ p2[0] + p2[1], 0.0) @ p2[2] + p2[3]
    out2 = jax.block_until_ready(projection_head(x2, *p2, block_h=128))
    assert out2.shape == (bn2, o2)
    assert jnp.allclose(out2, ref2, atol=1e-5, rtol=1e-5)

    # Test 3: bf16 MXU inputs with f32 accumulation via prepared params
    # (recommended on v6e/v7x; reuse `prepared` across repeated calls).
    prepared = prepare_params(w1, b1, w2, b2, compute_dtype=jnp.bfloat16)
    out_bf = jax.block_until_ready(projection_head_prepared(x, prepared))
    assert out_bf.shape == (batch, out_sz)
    assert jnp.allclose(out_bf, ref, atol=5e-2, rtol=5e-2)

    print("KERNEL_OK")
</pallas_src>

<mosaic_0001>
module attributes {stable_mosaic.version = 11 : i64} {
  func.func @_mlp_kernel(%arg0: i32, %arg1: i32, %arg2: memref<256x32xf32, #tpu.memory_space<vmem>>, %arg3: memref<32x64xf32, #tpu.memory_space<vmem>>, %arg4: memref<1x64xf32, #tpu.memory_space<vmem>>, %arg5: memref<64x128xf32, #tpu.memory_space<vmem>>, %arg6: memref<1x128xf32, #tpu.memory_space<vmem>>, %arg7: memref<256x128xf32, #tpu.memory_space<vmem>>, %arg8: memref<256x128xf32, #tpu.memory_space<vmem>>) attributes {dimension_semantics = [#tpu.dimension_semantics<parallel>, #tpu.dimension_semantics<arbitrary>], iteration_bounds = array<i64: 2, 1>, scalar_prefetch = 0 : i64, scratch_operands = 1 : i64, tpu.core_type = #tpu.core_type<tc>, window_params = [{transform_indices = @transform_0, window_bounds = array<i64: 256, 32>}, {transform_indices = @transform_1, window_bounds = array<i64: 32, 64>}, {transform_indices = @transform_2, window_bounds = array<i64: 1, 64>}, {transform_indices = @transform_3, window_bounds = array<i64: 64, 128>}, {pipeline_mode = #tpu.pipeline_mode<synchronous>, transform_indices = @transform_4, window_bounds = array<i64: 1, 128>}, {transform_indices = @transform_5, window_bounds = array<i64: 256, 128>}]} {
    %c0_i32 = arith.constant 0 : i32
    %0 = arith.cmpi eq, %arg1, %c0_i32 : i32
    %1 = arith.extui %0 : i1 to i32
    %c0_i32_0 = arith.constant 0 : i32
    %2 = arith.cmpi ne, %1, %c0_i32_0 : i32
    scf.if %2 {
      %cst_16 = arith.constant 0.000000e+00 : f32
      %19 = vector.broadcast %cst_16 : f32 to vector<256x128xf32>
      %c0_17 = arith.constant 0 : index
      %c0_18 = arith.constant 0 : index
      %20 = vector.load %arg8[%c0_17, %c0_18] : memref<256x128xf32, #tpu.memory_space<vmem>>, vector<256x128xf32>
      tpu.vector_store %arg8[%c0_17, %c0_18], %19 {strides = array<i32>} : memref<256x128xf32, #tpu.memory_space<vmem>>, vector<256x128xf32>,
    } else {
    }
    %c0 = arith.constant 0 : index
    %c0_1 = arith.constant 0 : index
    %3 = vector.load %arg2[%c0, %c0_1] : memref<256x32xf32, #tpu.memory_space<vmem>>, vector<256x32xf32>
    %c0_2 = arith.constant 0 : index
    %c0_3 = arith.constant 0 : index
    %4 = vector.load %arg3[%c0_2, %c0_3] : memref<32x64xf32, #tpu.memory_space<vmem>>, vector<32x64xf32>
    %cst = arith.constant dense<0.000000e+00> : vector<256x64xf32>
    %5 = tpu.matmul %3, %4, %cst {dimension_numbers = #tpu.dot_dimension_numbers<[1], [0], [0], [1], [0, 0, 1, 1], [], []>} : vector<256x32xf32>, vector<32x64xf32>, vector<256x64xf32> -> vector<256x64xf32>
    %c0_4 = arith.constant 0 : index
    %c0_5 = arith.constant 0 : index
    %6 = vector.load %arg4[%c0_4, %c0_5] : memref<1x64xf32, #tpu.memory_space<vmem>>, vector<1x64xf32>
    %7 = vector.broadcast %6 : vector<1x64xf32> to vector<256x64xf32>
    %8 = arith.addf %5, %7 : vector<256x64xf32>
    %cst_6 = arith.constant 0.000000e+00 : f32
    %9 = vector.broadcast %cst_6 : f32 to vector<256x64xf32>
    %10 = arith.maximumf %8, %9 : vector<256x64xf32>
    %c0_7 = arith.constant 0 : index
    %c0_8 = arith.constant 0 : index
    %11 = vector.load %arg8[%c0_7, %c0_8] : memref<256x128xf32, #tpu.memory_space<vmem>>, vector<256x128xf32>
    %c0_9 = arith.constant 0 : index
    %c0_10 = arith.constant 0 : index
    %12 = vector.load %arg5[%c0_9, %c0_10] : memref<64x128xf32, #tpu.memory_space<vmem>>, vector<64x128xf32>
    %cst_11 = arith.constant dense<0.000000e+00> : vector<256x128xf32>
    %13 = tpu.matmul %10, %12, %cst_11 {dimension_numbers = #tpu.dot_dimension_numbers<[1], [0], [0], [1], [0, 0, 1, 1], [], []>} : vector<256x64xf32>, vector<64x128xf32>, vector<256x128xf32> -> vector<256x128xf32>
    %14 = arith.addf %11, %13 : vector<256x128xf32>
    %c0_12 = arith.constant 0 : index
    %c0_13 = arith.constant 0 : index
    %15 = vector.load %arg8[%c0_12, %c0_13] : memref<256x128xf32, #tpu.memory_space<vmem>>, vector<256x128xf32>
    tpu.vector_store %arg8[%c0_12, %c0_13], %14 {strides = array<i32>} : memref<256x128xf32, #tpu.memory_space<vmem>>, vector<256x128xf32>,
    %c0_i32_14 = arith.constant 0 : i32
    %16 = arith.cmpi eq, %arg1, %c0_i32_14 : i32
    %17 = arith.extui %16 : i1 to i32
    %c0_i32_15 = arith.constant 0 : i32
    %18 = arith.cmpi ne, %17, %c0_i32_15 : i32
    scf.if %18 {
      %c0_16 = arith.constant 0 : index
      %c0_17 = arith.constant 0 : index
      %19 = vector.load %arg8[%c0_16, %c0_17] : memref<256x128xf32, #tpu.memory_space<vmem>>, vector<256x128xf32>
      %c0_18 = arith.constant 0 : index
      %c0_19 = arith.constant 0 : index
      %20 = vector.load %arg6[%c0_18, %c0_19] : memref<1x128xf32, #tpu.memory_space<vmem>>, vector<1x128xf32>
      %21 = vector.broadcast %20 : vector<1x128xf32> to vector<256x128xf32>
      %22 = arith.addf %19, %21 : vector<256x128xf32>
      %c0_20 = arith.constant 0 : index
      %c0_21 = arith.constant 0 : index
      %23 = vector.load %arg7[%c0_20, %c0_21] : memref<256x128xf32, #tpu.memory_space<vmem>>, vector<256x128xf32>
      tpu.vector_store %arg7[%c0_20, %c0_21], %22 {strides = array<i32>} : memref<256x128xf32, #tpu.memory_space<vmem>>, vector<256x128xf32>,
    } else {
    }
    return
  }
  func.func @transform_0(%arg0: i32, %arg1: i32) -> (i32, i32) {
    %c0_i32 = arith.constant 0 : i32
    %c0_i32_0 = arith.constant 0 : i32
    return %arg0, %c0_i32 : i32, i32
  }
  func.func @transform_1(%arg0: i32, %arg1: i32) -> (i32, i32) {
    %c0_i32 = arith.constant 0 : i32
    %c0_i32_0 = arith.constant 0 : i32
    return %c0_i32, %arg1 : i32, i32
  }
  func.func @transform_2(%arg0: i32, %arg1: i32) -> (i32, i32) {
    %c0_i32 = arith.constant 0 : i32
    %c0_i32_0 = arith.constant 0 : i32
    return %c0_i32, %arg1 : i32, i32
  }
  func.func @transform_3(%arg0: i32, %arg1: i32) -> (i32, i32) {
    %c0_i32 = arith.constant 0 : i32
    %c0_i32_0 = arith.constant 0 : i32
    return %arg1, %c0_i32 : i32, i32
  }
  func.func @transform_4(%arg0: i32, %arg1: i32) -> (i32, i32) {
    %c0_i32 = arith.constant 0 : i32
    %c0_i32_0 = arith.constant 0 : i32
    %c0_i32_1 = arith.constant 0 : i32
    return %c0_i32, %c0_i32_0 : i32, i32
  }
  func.func @transform_5(%arg0: i32, %arg1: i32) -> (i32, i32) {
    %c0_i32 = arith.constant 0 : i32
    %c0_i32_0 = arith.constant 0 : i32
    return %arg0, %c0_i32 : i32, i32
  }
}

</mosaic_0001>

<bundles_post_ra>
// kernel: tpu_custom_call.1
= control target key start
LH: loop header
LB: loop body
LE: loop exit
PB: predicated region body
PF: predicated region fallthrough
CT: control target
= control target key end

     0   :  { %10 = vsyncpa [#allocation4], 0  ;;  %s2224_s0 = inlined_call_operand.vmem [shape: f32[512,32], index: 0, kind: input, shape index: {}]   ;;  %s2225_s1 = inlined_call_operand.vmem [shape: f32[32,64], index: 1, kind: input, shape index: {}]   ;;  %s2226_s2 = inlined_call_operand.vmem [shape: f32[1,64], index: 2, kind: input, shape index: {}]   ;;  %s2227_s3 = inlined_call_operand.vmem [shape: f32[64,128], index: 3, kind: input, shape index: {}]   ;;  %s2228_s4 = inlined_call_operand.vmem [shape: f32[1,128], index: 4, kind: input, shape index: {}]   ;;  %s2229_s5 = inlined_call_operand.hbm [shape: f32[512,128], index: 5, kind: output, shape index: {}]  }
   0x1   :  { %12 = vsyncpa [#allocation4 + $0x1], 0  ;;  %s1863_s18 = smov 0   ;;  %s1865_s19 = smov 0  }
   0x2   :  { %s1867_s20 = smov 0   ;;  %s1869_s21 = smov 0  }
   0x3   :  { %s1871_s22 = smov 0   ;;  %s1873_s23 = smov 0  }
   0x4 LB: > { %s1382_s24 = sadd.s32 4294967295, %s1828_s23   ;;  %s1383_s25 = sadd.s32 4294967294, %s1828_s23   ;;  %s1828_s23 = sphi %s1873_s23, %s18_s23   ;;  %s1824_s22 = sphi %s1871_s22, %s2236_s22   ;;  %s1820_s21 = sphi %s1869_s21, %s2235_s21   ;;  %s1816_s20 = sphi %s1867_s20, %s2234_s20   ;;  %s1812_s19 = sphi %s1865_s19, %s2233_s19   ;;  %s1808_s18 = sphi %s1863_s18, %s2232_s18  }
   0x5   : > { %s30_s26 = sadd.s32 1, %s1824_s22  ;;  %s162_s27 = sadd.s32 1, %s1816_s20 }
   0x6   : > { %p32_p0 = scmp.ge.s32.totalorder %s30_s26, 2  ;;  %p172_p1 = scmp.ne.s32.totalorder %s1816_s20, %s1812_s19 }
   0x7   : > { %p173_p2 = scmp.eq.s32.totalorder %s1382_s24, 1  ;;  %p178_p3 = scmp.ne.s32.totalorder %s1812_s19, %s1808_s18 }
   0x8   : > { %s2238_s26 = smov (%p32_p0, %s30_s26), 0  ;;  %p179_p5 = scmp.eq.s32.totalorder %s1383_s25, 1 }
   0x9   : > { %p1903_p4 = por %p173_p2, %p172_p1  ;;  %s159_s29 = ssub.s32 %s1824_s22, %s2238_s26 }
   0xa   : > { %p1389_p6 = scmp.ge.s32.totalorder %s1828_s23, 1  ;;  %p160_p7 = scmp.eq.s32.totalorder %s159_s29, 0 }
   0xb   : > { %p1910_p8 = por %p179_p5, %p178_p3  ;;  %p231_p9 = scmp.lt.s32.totalorder %s1828_s23, 3 }
   0xc   : > { %s1916_s6 = scalar_select %p160_p7, %s1816_s20, %s162_s27  }
   0xd   : > { %p232_p10 = pnand %p1389_p6, %p231_p9 }
   0xe   : > { %v359_v0 = vld [vmem:[%s2225_s1] sm:$0xff] (!%p232_p10)  ;;  %v360_v1 = vld [vmem:[%s2225_s1 + $0x8] sm:$0xff] (!%p232_p10)  ;;  %v361_v2 = vld [vmem:[%s2225_s1 + $0x10] sm:$0xff] (!%p232_p10)  ;;  %s1391_s13 = sshll.u32 (!%p232_p10), %s1820_s21, 5  ;;  %vm370_vm0 = vcmask (!%p232_p10), 261120   ;;  %vm764_vm1 = vcmask (!%p232_p10), 523264  }
   0xf   : > { %235 = sbr.rel (%p232_p10) target bundleno = 535 (0x217), region = 40  ;;  %v1661_v3 = vpack.c.bf16 (!%p232_p10), %v360_v1, %v359_v0  ;;  %v362_v4 = vld [vmem:[%s2225_s1 + $0x18] sm:$0xff] (!%p232_p10)  ;;  %p272_p11 = scmp.lt.s32.totalorder (!%p232_p10), %s1391_s13, 63  ;;  %v756_v5 = vld [vmem:[%s2227_s3] sm:$0xff] (!%p232_p10)  ;;  %v757_v6 = vld [vmem:[%s2227_s3 + $0x8] sm:$0xff] (!%p232_p10) }
  0x10   : > { %v1665_v7 = vpack.c.bf16 (!%p232_p10), %v362_v4, %v361_v2  ;;  %v1669_v8 = vpack.c.bf16 (!%p232_p10), %v757_v6, %v756_v5  ;;  %v758_v9 = vld [vmem:[%s2227_s3 + $0x10] sm:$0xff] (!%p232_p10)  ;;  %v759_v10 = vld [vmem:[%s2227_s3 + $0x18] sm:$0xff] (!%p232_p10)  ;;  %v760_v12 = vld [vmem:[%s2227_s3 + $0x20] sm:$0xff] (!%p232_p10)  ;;  %s268_s8 = sand.u32 (!%p232_p10), 1, %s1812_s19   ;;  %s1464_s14 = sshll.u32 (!%p232_p10), %s1820_s21, 12 }
  0x11   : > { %1662 = vmatprep.subr.bf16.mxu0 (!%p232_p10), %v1661_v3  ;;  %v1673_v11 = vpack.c.bf16 (!%p232_p10), %v759_v10, %v758_v9  ;;  %v761_v13 = vld [vmem:[%s2227_s3 + $0x28] sm:$0xff] (!%p232_p10)  ;;  %v762_v47 = vld [vmem:[%s2227_s3 + $0x30] sm:$0xff] (!%p232_p10)  ;;  %v763_v48 = vld [vmem:[%s2227_s3 + $0x38] sm:$0xff] (!%p232_p10)  ;;  %s2178_s21 = scalar_lea.sflag (!%p232_p10), [#allocation4], %s268_s8  ;;  %s1830_s25 = smov (!%p232_p10), [#allocation3]  }
  0x12   : > { %1664 = vmatpush3.bf16.msra.mxu0 (!%p232_p10), %v1661_v3  ;;  %1685 = vmatprep.subr.bf16.mxu1 (!%p232_p10), %v1669_v8  ;;  %v1677_v16 = vpack.c.bf16 (!%p232_p10), %v761_v13, %v760_v12  ;;  %v1681_v49 = vpack.c.bf16 (!%p232_p10), %v763_v48, %v762_v47  ;;  %v2027_v50 = vld [vmem:[%s2226_s2] ss:$0 sm:$0xff] (!%p232_p10)  ;;  %s1754_s27 = sshll.u32 (!%p232_p10), %s1830_s25, 4  ;;  %s1755_s27 = int_to_ptr.vmem [resolvable:$false] %s1754_s27 }
  0x13   : > { %1666 = vmatprep.subr.bf16.mxu0 (!%p232_p10), %v1665_v7  ;;  %1689 = vmatpush3.bf16.msra.mxu1 (!%p232_p10), %v1669_v8  ;;  %s1756_s29 = scalar_lea.vmem (!%p232_p10), %s1755_s27, 8192 }
  0x14   : > { %1686 = vmatprep.subr.bf16.mxu1 (!%p232_p10), %v1673_v11 }
  0x16   : > { %s2240_s13 = smov (!%p272_p11, %s1391_s13), 63  ;;  %1668 = vmatpush3.bf16.msra.mxu0 %v1665_v7 }
  0x17   : > { %s1392_s9 = sshll.u32 %s2240_s13, 3  ;;  %1670 = vmatprep.subr.bf16.mxu0 %v1669_v8  ;;  %1690 = vmatpush3.bf16.msra.mxu1 %v1673_v11  ;;  %s2169_s13 = scalar_lea.hbm %s2229_s5, %s1464_s14 }
  0x18   : > { %s1952_s17 = scalar_lea.vmem %s2224_s0, %s1392_s9  ;;  %1687 = vmatprep.subr.bf16.mxu1 %v1677_v16  ;;  %s1390_s9 = sshll.u32 %s268_s8, 8 }
  0x19   : > { %v327_v14 = vld [vmem:[%s1952_s17] sm:$0xff]  ;;  %v328_v15 = vld [vmem:[%s1952_s17 + $0x8] sm:$0xff]  ;;  %v329_v17 = vld [vmem:[%s1952_s17 + $0x10] sm:$0xff]  ;;  %s2103_s12 = scalar_lea.vmem [#allocation3], %s1390_s9 }
  0x1a   : > { %1549 = vmatprep.mubr.msk.f32.mxu0 %vm370_vm0, %v327_v14  ;;  %v330_v18 = vld [vmem:[%s1952_s17 + $0x18] sm:$0xff]  ;;  %v331_v19 = vld [vmem:[%s1952_s17 + $0x20] sm:$0xff]  ;;  %v332_v20 = vld [vmem:[%s1952_s17 + $0x28] sm:$0xff]  ;;  %s1270_s15 = sshll.u32 %s2103_s12, 4  ;;  %s2171_s15 = int_to_ptr.vmem [resolvable:$true] %s1270_s15 }
  0x1b   : > { %1550 = vmatmul.mubr.msk.f32.vlgmr.msra.gmra.mrb[0].mxu0 %vm370_vm0, %v328_v15  ;;  %1691 = vmatpush3.bf16.msra.mxu1 %v1677_v16  ;;  %v333_v21 = vld [vmem:[%s1952_s17 + $0x30] sm:$0xff]  ;;  %v334_v22 = vld [vmem:[%s1952_s17 + $0x38] sm:$0xff]  ;;  %v335_v23 = vld [vmem:[%s1952_s17 + $0x40] sm:$0xff]  ;;  %s1750_s24 = scalar_lea.vmem %s2171_s15, 4096  ;;  %p1757_p1 = scmp.lt.s32.totalorder %s2171_s15, %s1755_s27 }
  0x1c   : > { %1552 = vmatprep.mubr.msk.f32.mxu0 %vm370_vm0, %v329_v17  ;;  %1672 = vmatpush3.bf16.msra.mxu0 %v1669_v8  ;;  %v336_v24 = vld [vmem:[%s1952_s17 + $0x48] sm:$0xff]  ;;  %v337_v25 = vld [vmem:[%s1952_s17 + $0x50] sm:$0xff]  ;;  %v338_v26 = vld [vmem:[%s1952_s17 + $0x58] sm:$0xff]  ;;  %p1751_p12 = scmp.ne.s32.totalorder %s2171_s15, %s1750_s24  ;;  %p1758_p2 = scmp.lt.s32.totalorder %s1756_s29, %s1750_s24 }
  0x1d   : > { %1674 = vmatprep.subr.bf16.mxu0 %v1673_v11  ;;  %v339_v27 = vld [vmem:[%s1952_s17 + $0x60] sm:$0xff]  ;;  %v340_v28 = vld [vmem:[%s1952_s17 + $0x68] sm:$0xff]  ;;  %v341_v29 = vld [vmem:[%s1952_s17 + $0x70] sm:$0xff]  ;;  %1688 = vmatprep.subr.bf16.mxu1 %v1681_v49 }
  0x1e   : > { %v342_v30 = vld [vmem:[%s1952_s17 + $0x78] sm:$0xff]  ;;  %v343_v31 = vld [vmem:[%s1952_s17 + $0x80] sm:$0xff]  ;;  %v344_v32 = vld [vmem:[%s1952_s17 + $0x88] sm:$0xff]  ;;  %p1752_p13 = pnand %p1751_p12, %p1903_p4  ;;  %p1759_p3 = por %p1758_p2, %p1757_p1 }
  0x1f   : > { %1553 = vmatmul.mubr.msk.f32.gmra.mrb[2].mxu0 %vm370_vm0, %v330_v18  ;;  %v345_v33 = vld [vmem:[%s1952_s17 + $0x90] sm:$0xff]  ;;  %v346_v34 = vld [vmem:[%s1952_s17 + $0x98] sm:$0xff]  ;;  %v347_v35 = vld [vmem:[%s1952_s17 + $0xa0] sm:$0xff]  ;;  %1692 = vmatpush3.bf16.msra.mxu1 %v1681_v49 }
  0x20   : > { %1555 = vmatprep.mubr.msk.f32.mxu0 %vm370_vm0, %v331_v19  ;;  %1676 = vmatpush3.bf16.msra.mxu0 %v1673_v11  ;;  %v348_v36 = vld [vmem:[%s1952_s17 + $0xa8] sm:$0xff]  ;;  %v349_v37 = vld [vmem:[%s1952_s17 + $0xb0] sm:$0xff]  ;;  %v350_v38 = vld [vmem:[%s1952_s17 + $0xb8] sm:$0xff]  ;;  %p1753_p0 = pneg %p1752_p13 }
  0x21   : > { %1678 = vmatprep.subr.bf16.mxu0 %v1677_v16  ;;  %v351_v39 = vld [vmem:[%s1952_s17 + $0xc0] sm:$0xff]  ;;  %v352_v40 = vld [vmem:[%s1952_s17 + $0xc8] sm:$0xff]  ;;  %v353_v41 = vld [vmem:[%s1952_s17 + $0xd0] sm:$0xff] }
  0x22   : > { %v354_v42 = vld [vmem:[%s1952_s17 + $0xd8] sm:$0xff]  ;;  %v355_v43 = vld [vmem:[%s1952_s17 + $0xe0] sm:$0xff]  ;;  %v356_v44 = vld [vmem:[%s1952_s17 + $0xe8] sm:$0xff]  ;;  %p1760_p5 = pnand %p1759_p3, %p1753_p0 }
  0x23   : > { %1556 = vmatmul.mubr.msk.f32.gmra.mrb[4].mxu0 %vm370_vm0, %v332_v20  ;;  %v357_v45 = vld [vmem:[%s1952_s17 + $0xf0] sm:$0xff]  ;;  %v358_v46 = vld [vmem:[%s1952_s17 + $0xf8] sm:$0xff] }
  0x24   : > { %1558 = vmatprep.mubr.msk.f32.mxu0 %vm370_vm0, %v333_v21  ;;  %1680 = vmatpush3.bf16.msra.mxu0 %v1677_v16 }
  0x25   : > { %1682 = vmatprep.subr.bf16.mxu0 %v1681_v49 }
  0x27   : > { %1559 = vmatmul.mubr.msk.f32.gmra.mrb[6].mxu0 %vm370_vm0, %v334_v22 }
  0x28   : > { %1561 = vmatprep.mubr.msk.f32.mxu0 %vm370_vm0, %v335_v23  ;;  %1684 = vmatpush3.bf16.msra.mxu0 %v1681_v49 }
  0x2b   : > { %1562 = vmatmul.mubr.msk.f32.gmra.mrb[8].mxu0 %vm370_vm0, %v336_v24 }
  0x2c   : > { %1564 = vmatprep.mubr.msk.f32.mxu0 %vm370_vm0, %v337_v25 }
  0x2f   : > { %1565 = vmatmul.mubr.msk.f32.gmra.mrb[10].mxu0 %vm370_vm0, %v338_v26 }
  0x30   : > { %1567 = vmatprep.mubr.msk.f32.mxu0 %vm370_vm0, %v339_v27 }
  0x33   : > { %1568 = vmatmul.mubr.msk.f32.gmra.mrb[12].mxu0 %vm370_vm0, %v340_v28 }
  0x34   : > { %1570 = vmatprep.mubr.msk.f32.mxu0 %vm370_vm0, %v341_v29 }
  0x37   : > { %1571 = vmatmul.mubr.msk.f32.gmra.mrb[14].mxu0 %vm370_vm0, %v342_v30 }
  0x38   : > { %1573 = vmatprep.mubr.msk.f32.mxu0 %vm370_vm0, %v343_v31 }
  0x3b   : > { %1574 = vmatmul.mubr.msk.f32.gmra.mrb[16].mxu0 %vm370_vm0, %v344_v32 }
  0x3c   : > { %1576 = vmatprep.mubr.msk.f32.mxu0 %vm370_vm0, %v345_v33 }
  0x3f   : > { %1577 = vmatmul.mubr.msk.f32.gmra.mrb[18].mxu0 %vm370_vm0, %v346_v34 }
  0x40   : > { %1579 = vmatprep.mubr.msk.f32.mxu0 %vm370_vm0, %v347_v35 }
  0x43   : > { %1580 = vmatmul.mubr.msk.f32.gmra.mrb[20].mxu0 %vm370_vm0, %v348_v36 }
  0x44   : > { %1582 = vmatprep.mubr.msk.f32.mxu0 %vm370_vm0, %v349_v37 }
  0x47   : > { %1583 = vmatmul.mubr.msk.f32.gmra.mrb[22].mxu0 %vm370_vm0, %v350_v38 }
  0x48   : > { %1585 = vmatprep.mubr.msk.f32.mxu0 %vm370_vm0, %v351_v39 }
  0x4b   : > { %1586 = vmatmul.mubr.msk.f32.gmra.mrb[24].mxu0 %vm370_vm0, %v352_v40 }
  0x4c   : > { %1588 = vmatprep.mubr.msk.f32.mxu0 %vm370_vm0, %v353_v41 }
  0x4f   : > { %1589 = vmatmul.mubr.msk.f32.gmra.mrb[26].mxu0 %vm370_vm0, %v354_v42 }
  0x50   : > { %1591 = vmatprep.mubr.msk.f32.mxu0 %vm370_vm0, %v355_v43 }
  0x53   : > { %1592 = vmatmul.mubr.msk.f32.gmra.mrb[28].mxu0 %vm370_vm0, %v356_v44 }
  0x54   : > { %1594 = vmatprep.mubr.msk.f32.mxu0 %vm370_vm0, %v357_v45 }
  0x57   : > { %1595 = vmatmul.mubr.msk.f32.gmra.mrb[30].mxu0 %vm370_vm0, %v358_v46 }
  0xee   : > { %v1551_v51 = vpop.f32.mrb[0].mxu0 }
  0xef   : > { %v539_v52 = vadd.f32 %v1551_v51, %v2027_v50  ;;  %v533_v53 = vpop.f32.mrb[1].mxu0 }
  0xf0   : > { %v534_v54 = vadd.f32 %v2027_v50, %v533_v53 }
  0xf1   : > { %v693_v57 = vmax.f32 %v539_v52, 0.0 }
  0xf2   : > { %v692_v55 = vmax.f32 %v534_v54, 0.0  ;;  %v1554_v56 = vpop.f32.mrb[2].mxu0 }
  0xf3   : > { %v549_v58 = vadd.f32 %v1554_v56, %v2027_v50  ;;  %v543_v59 = vpop.f32.mrb[3].mxu0 }
  0xf4   : > { %v544_v60 = vadd.f32 %v2027_v50, %v543_v59  ;;  %1613 = vmatprep.mubr.msk.f32.mxu0 %vm764_vm1, %v692_v55 }
  0xf5   : > { %1614 = vmatmul.mubr.msk.f32.vlgmr.msra.gmra.mrb[32].mxu0 %vm764_vm1, %v693_v57  ;;  %v695_v63 = vmax.f32 %v549_v58, 0.0 }
  0xf6   : > { %v694_v61 = vmax.f32 %v544_v60, 0.0  ;;  %v1557_v62 = vpop.f32.mrb[4].mxu0 }
  0xf7   : > { %v559_v0 = vadd.f32 %v1557_v62, %v2027_v50  ;;  %v553_v1 = vpop.f32.mrb[5].mxu0 }
  0xf8   : > { %v554_v2 = vadd.f32 %v2027_v50, %v553_v1  ;;  %1616 = vmatprep.mubr.msk.f32.mxu1 %vm764_vm1, %v694_v61 }
  0xf9   : > { %1617 = vmatmul.mubr.msk.f32.vlgmr.msra.gmra.mrb[0].mxu1 %vm764_vm1, %v695_v63  ;;  %v697_v5 = vmax.f32 %v559_v0, 0.0 }
  0xfa   : > { %v696_v3 = vmax.f32 %v554_v2, 0.0  ;;  %v1560_v4 = vpop.f32.mrb[6].mxu0 }
  0xfb   : > { %v569_v6 = vadd.f32 %v1560_v4, %v2027_v50  ;;  %v563_v7 = vpop.f32.mrb[7].mxu0 }
  0xfc   : > { %v564_v8 = vadd.f32 %v2027_v50, %v563_v7  ;;  %1619 = vmatprep.mubr.msk.f32.mxu1 %vm764_vm1, %v696_v3 }
  0xfd   : > { %1620 = vmatmul.mubr.msk.f32.gmra.mrb[2].mxu1 %vm764_vm1, %v697_v5  ;;  %v699_v11 = vmax.f32 %v569_v6, 0.0 }
  0xfe   : > { %v698_v9 = vmax.f32 %v564_v8, 0.0  ;;  %v1563_v10 = vpop.f32.mrb[8].mxu0 }
  0xff   : > { %v579_v12 = vadd.f32 %v1563_v10, %v2027_v50  ;;  %v573_v13 = vpop.f32.mrb[9].mxu0 }
 0x100   : > { %v574_v14 = vadd.f32 %v2027_v50, %v573_v13  ;;  %1622 = vmatprep.mubr.msk.f32.mxu1 %vm764_vm1, %v698_v9 }
 0x101   : > { %1623 = vmatmul.mubr.msk.f32.gmra.mrb[4].mxu1 %vm764_vm1, %v699_v11  ;;  %v701_v17 = vmax.f32 %v579_v12, 0.0 }
 0x102   : > { %v700_v15 = vmax.f32 %v574_v14, 0.0  ;;  %v1566_v16 = vpop.f32.mrb[10].mxu0 }
 0x103   : > { %v589_v18 = vadd.f32 %v1566_v16, %v2027_v50  ;;  %v583_v19 = vpop.f32.mrb[11].mxu0 }
 0x104   : > { %v584_v20 = vadd.f32 %v2027_v50, %v583_v19  ;;  %1625 = vmatprep.mubr.msk.f32.mxu1 %vm764_vm1, %v700_v15 }
 0x105   : > { %1626 = vmatmul.mubr.msk.f32.gmra.mrb[6].mxu1 %vm764_vm1, %v701_v17  ;;  %v703_v23 = vmax.f32 %v589_v18, 0.0 }
 0x106   : > { %v702_v21 = vmax.f32 %v584_v20, 0.0  ;;  %v1569_v22 = vpop.f32.mrb[12].mxu0  ;;  %v2099_v20 = vld [vmem:[%s2228_s4] ss:$0 sm:$0xff] }
 0x107   : > { %v599_v24 = vadd.f32 %v1569_v22, %v2027_v50  ;;  %v593_v25 = vpop.f32.mrb[13].mxu0 }
 0x108   : > { %v594_v26 = vadd.f32 %v2027_v50, %v593_v25  ;;  %1628 = vmatprep.mubr.msk.f32.mxu1 %vm764_vm1, %v702_v21 }
 0x109   : > { %1629 = vmatmul.mubr.msk.f32.gmra.mrb[8].mxu1 %vm764_vm1, %v703_v23  ;;  %v705_v29 = vmax.f32 %v599_v24, 0.0 }
 0x10a   : > { %v704_v27 = vmax.f32 %v594_v26, 0.0  ;;  %v1572_v28 = vpop.f32.mrb[14].mxu0 }
 0x10b   : > { %v609_v30 = vadd.f32 %v1572_v28, %v2027_v50  ;;  %v603_v31 = vpop.f32.mrb[15].mxu0 }
 0x10c   : > { %v604_v32 = vadd.f32 %v2027_v50, %v603_v31  ;;  %1631 = vmatprep.mubr.msk.f32.mxu1 %vm764_vm1, %v704_v27 }
 0x10d   : > { %1632 = vmatmul.mubr.msk.f32.gmra.mrb[10].mxu1 %vm764_vm1, %v705_v29  ;;  %v707_v35 = vmax.f32 %v609_v30, 0.0 }
 0x10e   : > { %v706_v33 = vmax.f32 %v604_v32, 0.0  ;;  %v1575_v34 = vpop.f32.mrb[16].mxu0 }
 0x10f   : > { %v619_v36 = vadd.f32 %v1575_v34, %v2027_v50  ;;  %v613_v37 = vpop.f32.mrb[17].mxu0 }
 0x110   : > { %v614_v38 = vadd.f32 %v2027_v50, %v613_v37  ;;  %1634 = vmatprep.mubr.msk.f32.mxu1 %vm764_vm1, %v706_v33 }
 0x111   : > { %1635 = vmatmul.mubr.msk.f32.gmra.mrb[12].mxu1 %vm764_vm1, %v707_v35  ;;  %v709_v41 = vmax.f32 %v619_v36, 0.0 }
 0x112   : > { %v708_v39 = vmax.f32 %v614_v38, 0.0  ;;  %v1578_v40 = vpop.f32.mrb[18].mxu0 }
 0x113   : > { %v629_v42 = vadd.f32 %v1578_v40, %v2027_v50  ;;  %v623_v43 = vpop.f32.mrb[19].mxu0 }
 0x114   : > { %v624_v44 = vadd.f32 %v2027_v50, %v623_v43  ;;  %1637 = vmatprep.mubr.msk.f32.mxu1 %vm764_vm1, %v708_v39 }
 0x115   : > { %1638 = vmatmul.mubr.msk.f32.gmra.mrb[14].mxu1 %vm764_vm1, %v709_v41  ;;  %v711_v47 = vmax.f32 %v629_v42, 0.0 }
 0x116   : > { %v710_v45 = vmax.f32 %v624_v44, 0.0  ;;  %v1581_v46 = vpop.f32.mrb[20].mxu0 }
 0x117   : > { %v639_v48 = vadd.f32 %v1581_v46, %v2027_v50  ;;  %v633_v49 = vpop.f32.mrb[21].mxu0 }
 0x118   : > { %v634_v51 = vadd.f32 %v2027_v50, %v633_v49  ;;  %1640 = vmatprep.mubr.msk.f32.mxu1 %vm764_vm1, %v710_v45 }
 0x119   : > { %1641 = vmatmul.mubr.msk.f32.gmra.mrb[16].mxu1 %vm764_vm1, %v711_v47  ;;  %v713_v54 = vmax.f32 %v639_v48, 0.0 }
 0x11a   : > { %v712_v52 = vmax.f32 %v634_v51, 0.0  ;;  %v1584_v53 = vpop.f32.mrb[22].mxu0 }
 0x11b   : > { %v649_v55 = vadd.f32 %v1584_v53, %v2027_v50  ;;  %v643_v56 = vpop.f32.mrb[23].mxu0 }
 0x11c   : > { %v644_v57 = vadd.f32 %v2027_v50, %v643_v56  ;;  %1643 = vmatprep.mubr.msk.f32.mxu1 %vm764_vm1, %v712_v52 }
 0x11d   : > { %1644 = vmatmul.mubr.msk.f32.gmra.mrb[18].mxu1 %vm764_vm1, %v713_v54  ;;  %v715_v60 = vmax.f32 %v649_v55, 0.0 }
 0x11e   : > { %v714_v58 = vmax.f32 %v644_v57, 0.0  ;;  %v1587_v59 = vpop.f32.mrb[24].mxu0 }
 0x11f   : > { %v659_v61 = vadd.f32 %v1587_v59, %v2027_v50  ;;  %v653_v62 = vpop.f32.mrb[25].mxu0 }
 0x120   : > { %v654_v63 = vadd.f32 %v2027_v50, %v653_v62  ;;  %1646 = vmatprep.mubr.msk.f32.mxu1 %vm764_vm1, %v714_v58 }
 0x121   : > { %1647 = vmatmul.mubr.msk.f32.gmra.mrb[20].mxu1 %vm764_vm1, %v715_v60  ;;  %v717_v2 = vmax.f32 %v659_v61, 0.0 }
 0x122   : > { %v716_v0 = vmax.f32 %v654_v63, 0.0  ;;  %v1590_v1 = vpop.f32.mrb[26].mxu0 }
 0x123   : > { %v669_v3 = vadd.f32 %v1590_v1, %v2027_v50  ;;  %v663_v4 = vpop.f32.mrb[27].mxu0 }
 0x124   : > { %v664_v5 = vadd.f32 %v2027_v50, %v663_v4  ;;  %1649 = vmatprep.mubr.msk.f32.mxu1 %vm764_vm1, %v716_v0 }
 0x125   : > { %1650 = vmatmul.mubr.msk.f32.gmra.mrb[22].mxu1 %vm764_vm1, %v717_v2  ;;  %v719_v8 = vmax.f32 %v669_v3, 0.0 }
 0x126   : > { %v718_v6 = vmax.f32 %v664_v5, 0.0  ;;  %v1593_v7 = vpop.f32.mrb[28].mxu0 }
 0x127   : > { %v679_v9 = vadd.f32 %v1593_v7, %v2027_v50  ;;  %v673_v10 = vpop.f32.mrb[29].mxu0 }
 0x128   : > { %v674_v11 = vadd.f32 %v2027_v50, %v673_v10  ;;  %1652 = vmatprep.mubr.msk.f32.mxu1 %vm764_vm1, %v718_v6 }
 0x129   : > { %1653 = vmatmul.mubr.msk.f32.gmra.mrb[24].mxu1 %vm764_vm1, %v719_v8  ;;  %v721_v14 = vmax.f32 %v679_v9, 0.0 }
 0x12a   : > { %v720_v12 = vmax.f32 %v674_v11, 0.0  ;;  %v1596_v13 = vpop.f32.mrb[30].mxu0 }
 0x12b   : > { %v689_v15 = vadd.f32 %v1596_v13, %v2027_v50  ;;  %v683_v16 = vpop.f32.mrb[31].mxu0 }
 0x12c   : > { %v684_v17 = vadd.f32 %v2027_v50, %v683_v16  ;;  %1655 = vmatprep.mubr.msk.f32.mxu1 %vm764_vm1, %v720_v12 }
 0x12d   : > { %1656 = vmatmul.mubr.msk.f32.gmra.mrb[26].mxu1 %vm764_vm1, %v721_v14  ;;  %v723_v19 = vmax.f32 %v689_v15, 0.0 }
 0x12e   : > { %v722_v18 = vmax.f32 %v684_v17, 0.0 }
 0x130   : > { %1658 = vmatprep.mubr.msk.f32.mxu1 %vm764_vm1, %v722_v18 }
 0x131   : > { %1659 = vmatmul.mubr.msk.f32.gmra.mrb[28].mxu1 %vm764_vm1, %v723_v19 }
 0x1c8   : > { %v1615_v21 = vpop.f32.mrb[32].mxu0 }
 0x1c9   : > { %v1193_v50 = vadd.f32 %v1615_v21, %v2099_v20  ;;  %v927_v22 = vpop.f32.mrb[33].mxu0 }
 0x1ca   : > { %v1192_v23 = vadd.f32 %v2099_v20, %v927_v22 }
 0x1cb   : > { %1225 = vst [vmem:[%s2103_s12 + $0x8] sm:$0xff] %v1193_v50 }
 0x1cc   : > { %1224 = vst [vmem:[%s2103_s12] sm:$0xff] %v1192_v23  ;;  %v1618_v24 = vpop.f32.mrb[0].mxu1 }
 0x1cd   : > { %v1195_v25 = vadd.f32 %v1618_v24, %v2099_v20  ;;  %v937_v26 = vpop.f32.mrb[1].mxu1 }
 0x1ce   : > { %v1194_v27 = vadd.f32 %v2099_v20, %v937_v26 }
 0x1cf   : > { %1227 = vst [vmem:[%s2103_s12 + $0x18] sm:$0xff] %v1195_v25 }
 0x1d0   : > { %1226 = vst [vmem:[%s2103_s12 + $0x10] sm:$0xff] %v1194_v27  ;;  %v1621_v28 = vpop.f32.mrb[2].mxu1 }
 0x1d1   : > { %v1197_v29 = vadd.f32 %v1621_v28, %v2099_v20  ;;  %v947_v30 = vpop.f32.mrb[3].mxu1 }
 0x1d2   : > { %v1196_v31 = vadd.f32 %v2099_v20, %v947_v30 }
 0x1d3   : > { %1229 = vst [vmem:[%s2103_s12 + $0x28] sm:$0xff] %v1197_v29 }
 0x1d4   : > { %1228 = vst [vmem:[%s2103_s12 + $0x20] sm:$0xff] %v1196_v31  ;;  %v1624_v32 = vpop.f32.mrb[4].mxu1 }
 0x1d5   : > { %v1199_v33 = vadd.f32 %v1624_v32, %v2099_v20  ;;  %v957_v34 = vpop.f32.mrb[5].mxu1 }
 0x1d6   : > { %v1198_v35 = vadd.f32 %v2099_v20, %v957_v34 }
 0x1d7   : > { %1231 = vst [vmem:[%s2103_s12 + $0x38] sm:$0xff] %v1199_v33 }
 0x1d8   : > { %1230 = vst [vmem:[%s2103_s12 + $0x30] sm:$0xff] %v1198_v35  ;;  %v1627_v36 = vpop.f32.mrb[6].mxu1 }
 0x1d9   : > { %v1201_v37 = vadd.f32 %v1627_v36, %v2099_v20  ;;  %v967_v38 = vpop.f32.mrb[7].mxu1 }
 0x1da   : > { %v1200_v39 = vadd.f32 %v2099_v20, %v967_v38 }
 0x1db   : > { %1233 = vst [vmem:[%s2103_s12 + $0x48] sm:$0xff] %v1201_v37 }
 0x1dc   : > { %1232 = vst [vmem:[%s2103_s12 + $0x40] sm:$0xff] %v1200_v39  ;;  %v1630_v40 = vpop.f32.mrb[8].mxu1 }
 0x1dd   : > { %v1203_v41 = vadd.f32 %v1630_v40, %v2099_v20  ;;  %v977_v42 = vpop.f32.mrb[9].mxu1 }
 0x1de   : > { %v1202_v43 = vadd.f32 %v2099_v20, %v977_v42 }
 0x1df   : > { %1235 = vst [vmem:[%s2103_s12 + $0x58] sm:$0xff] %v1203_v41 }
 0x1e0   : > { %1234 = vst [vmem:[%s2103_s12 + $0x50] sm:$0xff] %v1202_v43  ;;  %v1633_v44 = vpop.f32.mrb[10].mxu1 }
 0x1e1   : > { %v1205_v45 = vadd.f32 %v1633_v44, %v2099_v20  ;;  %v987_v46 = vpop.f32.mrb[11].mxu1 }
 0x1e2   : > { %v1204_v47 = vadd.f32 %v2099_v20, %v987_v46 }
 0x1e3   : > { %1237 = vst [vmem:[%s2103_s12 + $0x68] sm:$0xff] %v1205_v45 }
 0x1e4   : > { %1236 = vst [vmem:[%s2103_s12 + $0x60] sm:$0xff] %v1204_v47  ;;  %v1636_v48 = vpop.f32.mrb[12].mxu1 }
 0x1e5   : > { %v1207_v49 = vadd.f32 %v1636_v48, %v2099_v20  ;;  %v997_v51 = vpop.f32.mrb[13].mxu1 }
 0x1e6   : > { %v1206_v52 = vadd.f32 %v2099_v20, %v997_v51 }
 0x1e7   : > { %1239 = vst [vmem:[%s2103_s12 + $0x78] sm:$0xff] %v1207_v49 }
 0x1e8   : > { %1238 = vst [vmem:[%s2103_s12 + $0x70] sm:$0xff] %v1206_v52  ;;  %v1639_v53 = vpop.f32.mrb[14].mxu1 }
 0x1e9   : > { %v1209_v54 = vadd.f32 %v1639_v53, %v2099_v20  ;;  %v1007_v55 = vpop.f32.mrb[15].mxu1 }
 0x1ea   : > { %v1208_v56 = vadd.f32 %v2099_v20, %v1007_v55 }
 0x1eb   : > { %1241 = vst [vmem:[%s2103_s12 + $0x88] sm:$0xff] %v1209_v54 }
 0x1ec   : > { %1240 = vst [vmem:[%s2103_s12 + $0x80] sm:$0xff] %v1208_v56  ;;  %v1642_v57 = vpop.f32.mrb[16].mxu1 }
 0x1ed   : > { %v1211_v58 = vadd.f32 %v1642_v57, %v2099_v20  ;;  %v1017_v59 = vpop.f32.mrb[17].mxu1 }
 0x1ee   : > { %v1210_v60 = vadd.f32 %v2099_v20, %v1017_v59 }
 0x1ef   : > { %1243 = vst [vmem:[%s2103_s12 + $0x98] sm:$0xff] %v1211_v58 }
 0x1f0   : > { %1242 = vst [vmem:[%s2103_s12 + $0x90] sm:$0xff] %v1210_v60  ;;  %v1645_v61 = vpop.f32.mrb[18].mxu1 }
 0x1f1   : > { %v1213_v62 = vadd.f32 %v1645_v61, %v2099_v20  ;;  %v1027_v63 = vpop.f32.mrb[19].mxu1 }
 0x1f2   : > { %v1212_v0 = vadd.f32 %v2099_v20, %v1027_v63 }
 0x1f3   : > { %1245 = vst [vmem:[%s2103_s12 + $0xa8] sm:$0xff] %v1213_v62 }
 0x1f4   : > { %1244 = vst [vmem:[%s2103_s12 + $0xa0] sm:$0xff] %v1212_v0  ;;  %v1648_v1 = vpop.f32.mrb[20].mxu1 }
 0x1f5   : > { %v1215_v2 = vadd.f32 %v1648_v1, %v2099_v20  ;;  %v1037_v3 = vpop.f32.mrb[21].mxu1 }
 0x1f6   : > { %v1214_v4 = vadd.f32 %v2099_v20, %v1037_v3 }
 0x1f7   : > { %1247 = vst [vmem:[%s2103_s12 + $0xb8] sm:$0xff] %v1215_v2 }
 0x1f8   : > { %1246 = vst [vmem:[%s2103_s12 + $0xb0] sm:$0xff] %v1214_v4  ;;  %v1651_v5 = vpop.f32.mrb[22].mxu1 }
 0x1f9   : > { %v1217_v6 = vadd.f32 %v1651_v5, %v2099_v20  ;;  %v1047_v7 = vpop.f32.mrb[23].mxu1 }
 0x1fa   : > { %v1216_v8 = vadd.f32 %v2099_v20, %v1047_v7 }
 0x1fb   : > { %1249 = vst [vmem:[%s2103_s12 + $0xc8] sm:$0xff] %v1217_v6 }
 0x1fc   : > { %1248 = vst [vmem:[%s2103_s12 + $0xc0] sm:$0xff] %v1216_v8  ;;  %v1654_v9 = vpop.f32.mrb[24].mxu1 }
 0x1fd   : > { %v1219_v10 = vadd.f32 %v1654_v9, %v2099_v20  ;;  %v1057_v11 = vpop.f32.mrb[25].mxu1 }
 0x1fe   : > { %v1218_v12 = vadd.f32 %v2099_v20, %v1057_v11 }
 0x1ff   : > { %1251 = vst [vmem:[%s2103_s12 + $0xd8] sm:$0xff] %v1219_v10 }
 0x200   : > { %1250 = vst [vmem:[%s2103_s12 + $0xd0] sm:$0xff] %v1218_v12  ;;  %v1657_v13 = vpop.f32.mrb[26].mxu1 }
 0x201   : > { %v1221_v14 = vadd.f32 %v1657_v13, %v2099_v20  ;;  %v1067_v15 = vpop.f32.mrb[27].mxu1 }
 0x202   : > { %v1220_v16 = vadd.f32 %v2099_v20, %v1067_v15 }
 0x203   : > { %1253 = vst [vmem:[%s2103_s12 + $0xe8] sm:$0xff] %v1221_v14 }
 0x204   : > { %1252 = vst [vmem:[%s2103_s12 + $0xe0] sm:$0xff] %v1220_v16  ;;  %v1660_v17 = vpop.f32.mrb[28].mxu1 }
 0x205   : > { %v1223_v18 = vadd.f32 %v1660_v17, %v2099_v20  ;;  %v1077_v19 = vpop.f32.mrb[29].mxu1 }
 0x206   : > { %v1222_v21 = vadd.f32 %v2099_v20, %v1077_v19 }
 0x207   : > { %1255 = vst [vmem:[%s2103_s12 + $0xf8] sm:$0xff] %v1223_v18 }
 0x208   : > { %1254 = vst [vmem:[%s2103_s12 + $0xf0] sm:$0xff] %v1222_v21 }
 0x209   : > { %1763 = shalt.err (!%p1760_p5)
}
 0x20a   : > { %s1764_s7 = scalar_lea.hbm %s2169_s13, 4096  ;;  %s1768_s10 = scalar_lea.hbm %s2229_s5, 8192 }
 0x20b   : > { %p1765_p6 = scmp.ne.s32.totalorder %s2169_s13, %s1764_s7  ;;  %p1769_p10 = scmp.lt.u32.totalorder %s2169_s13, %s2229_s5 }
 0x20c   : > { %p1770_p11 = scmp.lt.u32.totalorder %s1768_s10, %s1764_s7  ;;  %p1772_p13 = scmp.lt.u32.totalorder %s1764_s7, %s2169_s13 }
 0x20d   : > { %p1766_p7 = pnand %p1765_p6, %p1903_p4 }
 0x20e   : > { %p1771_p12 = por %p1770_p11, %p1769_p10 }
 0x20f   : > { %p1767_p9 = pneg %p1766_p7 }
 0x210   : > { %p1773_p0 = por %p1772_p13, %p1771_p12 }
 0x212   : > { %p1774_p1 = pnand %p1773_p0, %p1767_p9 }
 0x214   : > { %1777 = shalt.err (!%p1774_p1)
}
 0x215   : > { %s1831_s14 = smov 128   ;;  %s1832_s16 = smov 8  }
 0x216   : > { %1693 = dma.vmem_to_hbm [thread:$0]  (%p1903_p4), %s2171_s15, 4096, %s2169_s13, %s2178_s21, %s1831_s14, %s1831_s14, %s1832_s16  }
 0x217 PF: > { %p1699_p2 = scmp.ge.s32.totalorder %s1828_s23, 2  ;;  %s1285_s17 = sand.u32 1, %s1808_s18  }
 0x218   : > { %s1286_s24 = scalar_lea.sflag [#allocation4], %s1285_s17 }
 0x219   : > { %p1696_p3 = pnand %p1699_p2, %p1910_p8 }
 0x21b   : > { %1803 = dma.done.wait (!%p1696_p3), %s1286_s24, 4096  }
 0x21c   : > { %1805 = vsyncadd (!%p1696_p3), %s1286_s24, 4294963200  ;;  %s18_s23 = sadd.s32 1, %s1828_s23   ;;  %s2232_s18 = smov %s1812_s19 }
 0x21d   : > { %p15_p5 = scmp.ge.s32.totalorder %s18_s23, 4   ;;  %s2233_s19 = smov %s1816_s20 }
 0x21e   : > { %s2234_s20 = smov %s1916_s6  ;;  %s2235_s21 = smov %s1824_s22 }
 0x21f   : > { %s2236_s22 = smov %s2238_s26  ;;  %17 = sbr.rel (!%p15_p5) target bundleno = 4 (0x4), region = 92 }
 0x226   :  { %1291 = vsyncpa [#allocation4], 1 }
 0x227   :  { %1293 = vsyncpa [#allocation4 + $0x1], 1 }

</bundles_post_ra>
